<compile_context>
chip_gen: v6e
topology: v6e:2x2x1
jax: 0.10.0
libtpu: 0.0.40
codegen_flags: <defaults>
</compile_context>

<pallas_src>
import functools

import jax
import jax.numpy as jnp
from jax import lax
from jax.experimental import pallas as pl
from jax.experimental.pallas import tpu as pltpu


def _round_up(x, m):
    return ((x + m - 1) // m) * m


def _cdiv(a, b):
    return -(-a // b)


def nc1_loss_kernel(x_ref, labels_ref, mu_hi_ref, mu_lo_ref, d_ref, n_ref,
                    *, batch, blocks_per_split):
    # x_ref:      (TILE_B, D)   f32  VMEM (boundary block may be ragged -> masked)
    # labels_ref: (TILE_B, 1)   i32  VMEM
    # mu_hi_ref:  (C_pad, D)    bf16 VMEM (hi part of f32 means, grid-resident)
    # mu_lo_ref:  (C_pad, D)    bf16 VMEM (lo residual,          grid-resident)
    # d_ref:      (1, 1, C_pad) f32  per-split per-class sum ||x - mu_y||^2
    # n_ref:      (1, 1, C_pad) f32  per-split per-class sample counts
    c = pl.program_id(0)           # split ("parallel" -> per-TensorCore on v7x)
    i = pl.program_id(1)           # batch block within split ("arbitrary")

    @pl.when(i == 0)
    def _init():
        d_ref[...] = jnp.zeros_like(d_ref)
        n_ref[...] = jnp.zeros_like(n_ref)

    x = x_ref[...]                                    # (TB, D) f32
    labels = labels_ref[...]                          # (TB, 1) i32
    tb = x.shape[0]
    cp = mu_hi_ref.shape[0]

    # Row validity from the *logical* (unclamped) block index: ragged tails and
    # duplicated clamp-blocks contribute nothing.
    base = (c * blocks_per_split + i) * tb
    row = base + lax.broadcasted_iota(jnp.int32, (tb, 1), 0)
    valid = row < batch                               # (TB, 1) bool

    # One-hot membership mask; invalid rows forced all-zero so garbage features
    # or labels from out-of-bounds reads never reach the accumulators.
    classes = lax.broadcasted_iota(jnp.int32, (tb, cp), 1)
    eq = (labels == classes) & valid                  # (TB, Cp) bool
    mask_bf = eq.astype(jnp.bfloat16)                 # 0/1 exact in bf16

    # Gather each row's class mean on the bf16 MXU (one-hot rows pick out
    # mu_hi + mu_lo verbatim; f32 accumulation keeps ~2^-16 relative accuracy).
    mu_y = jnp.dot(mask_bf, mu_hi_ref[...], preferred_element_type=jnp.float32)
    mu_y = mu_y + jnp.dot(mask_bf, mu_lo_ref[...],
                          preferred_element_type=jnp.float32)

    diff = x - mu_y
    d_b = jnp.sum(diff * diff, axis=1, keepdims=True)      # (TB, 1)

    # Per-class scatter-add via VPU select + sublane reduce (no skinny matmul);
    # jnp.where also guards against NaN*0 from garbage boundary rows.
    d_contrib = jnp.sum(jnp.where(eq, d_b, 0.0), axis=0, keepdims=True)   # (1, Cp)
    n_contrib = jnp.sum(eq.astype(jnp.float32), axis=0, keepdims=True)    # (1, Cp)

    d_ref[...] += d_contrib[None]
    n_ref[...] += n_contrib[None]


def _vmem_capacity_bytes():
    try:
        return int(pltpu.get_tpu_info().vmem_capacity_bytes)
    except Exception:
        return 64 * 1024 * 1024      # conservative per-core (v7x) fallback


def _plan_tiles(batch, d, c_pad, vmem_cap):
    """Pick TILE_B and vmem_limit from the VMEM budget incl. kernel temporaries."""
    # per-row: double-buffered x+labels tiles, mu_y/diff f32 temps,
    # bf16 mask + two (TB,Cp) f32 temporaries for the scatter/count reduce.
    per_row = 2 * (d + 1) * 4 + 2 * d * 4 + c_pad * (2 + 4 + 4) + 64
    # fixed: double-buffered hi/lo means + accumulator output blocks + slack.
    fixed = 2 * 2 * c_pad * d * 2 + 4 * c_pad * 4 + (4 << 20)
    budget = (vmem_cap * 6) // 10                   # headroom for compiler scratch
    max_rows = max(8, (budget - fixed) // per_row)
    tile = min(2048, int(max_rows))
    if batch >= 8:
        tile = min(tile, (batch // 8) * 8)          # block never exceeds the array
    tile = max(8, (tile // 8) * 8)
    needed = fixed + tile * per_row
    vmem_limit = int(min(max(needed, 32 * 1024 * 1024), (vmem_cap * 3) // 4))
    return tile, vmem_limit


def nc1_loss(x, labels, means):
    """Pallas implementation of NC1Loss.forward. Returns (loss, means)."""
    B, D = x.shape
    C, D2 = means.shape
    assert D == D2

    c_pad = _round_up(C, 128)                       # lane-dense class axis
    vmem_cap = _vmem_capacity_bytes()
    tile_b, vmem_limit = _plan_tiles(max(B, 8), D, c_pad, vmem_cap)

    x32 = x.astype(jnp.float32)
    labels2 = labels.astype(jnp.int32).reshape(B, 1)
    if B < 8:                                       # only trivially small batches pad
        x32 = jnp.zeros((8, D), jnp.float32).at[:B].set(x32)
        labels2 = jnp.full((8, 1), -1, jnp.int32).at[:B].set(labels2)

    b_arr = x32.shape[0]
    nb = _cdiv(b_arr, tile_b)
    num_splits = 2 if nb >= 2 else 1                # both TensorCores on v7x
    blocks_per_split = _cdiv(nb, num_splits)
    grid = (num_splits, blocks_per_split)

    # Exact hi/lo bf16 split of the (class-padded) means.
    mu32 = jnp.zeros((c_pad, D), jnp.float32).at[:C].set(means.astype(jnp.float32))
    mu_hi = mu32.astype(jnp.bfloat16)
    mu_lo = (mu32 - mu_hi.astype(jnp.float32)).astype(jnp.bfloat16)

    def batch_map(c, i):
        # Clamp to the last real block; duplicated blocks are fully masked in-kernel.
        return (jnp.minimum(c * blocks_per_split + i, nb - 1), 0)

    kernel = functools.partial(nc1_loss_kernel, batch=B,
                               blocks_per_split=blocks_per_split)

    cost = pl.CostEstimate(
        flops=int(2 * 2 * b_arr * c_pad * D + 6 * b_arr * (D + c_pad)),
        transcendentals=0,
        bytes_accessed=int(b_arr * (D + 1) * 4 + 2 * c_pad * D * 2
                           + 2 * num_splits * c_pad * 4),
    )

    d_parts, n_parts = pl.pallas_call(
        kernel,
        out_shape=(jax.ShapeDtypeStruct((num_splits, 1, c_pad), jnp.float32),
                   jax.ShapeDtypeStruct((num_splits, 1, c_pad), jnp.float32)),
        grid_spec=pltpu.PrefetchScalarGridSpec(
            num_scalar_prefetch=0,
            grid=grid,
            in_specs=[
                pl.BlockSpec((tile_b, D), batch_map),            # x batch tile
                pl.BlockSpec((tile_b, 1), batch_map),            # labels batch tile
                pl.BlockSpec((c_pad, D), lambda c, i: (0, 0)),   # means hi, resident
                pl.BlockSpec((c_pad, D), lambda c, i: (0, 0)),   # means lo, resident
            ],
            out_specs=(
                pl.BlockSpec((1, 1, c_pad), lambda c, i: (c, 0, 0)),  # per-split D
                pl.BlockSpec((1, 1, c_pad), lambda c, i: (c, 0, 0)),  # per-split N
            ),
        ),
        compiler_params=pltpu.CompilerParams(
            dimension_semantics=("parallel", "arbitrary"),
            vmem_limit_bytes=vmem_limit,
        ),
        cost_estimate=cost,
    )(x32, labels2, mu_hi, mu_lo)

    # Finalize (exact f32 divide / clip / mean) in the wrapper: O(C) work.
    d_cls = jnp.sum(d_parts[:, 0, :], axis=0)[:C]
    n_cls = jnp.sum(n_parts[:, 0, :], axis=0)[:C] + 1e-10
    loss = jnp.sum(jnp.clip(d_cls / n_cls, 1e-12, 1.0e12)) / C

    # TODO(synk): for very large C*D (means not comfortably VMEM-resident), add a
    # class-block reduction axis instead of shrinking TILE_B.
    return loss, means


def nc1_loss_ref(x, labels, means):
    """Pure-JAX reference mirroring the PyTorch forward exactly."""
    C = means.shape[0]
    x = x.astype(jnp.float32)
    means = means.astype(jnp.float32)
    distmat = (jnp.sum(x ** 2, axis=1, keepdims=True)
               + jnp.sum(means ** 2, axis=1, keepdims=True).T
               - 2.0 * x @ means.T)
    classes = jnp.arange(C, dtype=jnp.int32)
    mask = (labels[:, None].astype(jnp.int32) == classes[None, :]).astype(jnp.float32)
    dist = distmat * mask
    Dm = jnp.sum(dist, axis=0)
    Nm = jnp.sum(mask, axis=0) + 1e-10
    return jnp.sum(jnp.clip(Dm / Nm, 1e-12, 1.0e12)) / C


if __name__ == "__main__":
    key = jax.random.PRNGKey(0)

    # (batch, num_classes, feat_dim): module-default single-block case, a ragged
    # two-split case, and a non-128 feature-dim ragged case.
    for (batch, num_classes, feat_dim) in [(8, 10, 128), (300, 37, 128), (530, 10, 64)]:
        k_means, k_x, k_lab, key = jax.random.split(key, 4)
        means = jax.random.normal(k_means, (num_classes, feat_dim), dtype=jnp.float32)
        x = jax.random.normal(k_x, (batch, feat_dim), dtype=jnp.float32)
        labels = jax.random.randint(k_lab, (batch,), 0, num_classes, dtype=jnp.int32)

        loss, means_out = nc1_loss(x, labels, means)
        jax.block_until_ready(loss)

        ref = nc1_loss_ref(x, labels, means)
        assert jnp.allclose(loss, ref, rtol=1e-4, atol=1e-4), (batch, float(loss), float(ref))
        assert means_out.shape == (num_classes, feat_dim)

    print("KERNEL_OK")
</pallas_src>

<mosaic_0001>
module attributes {stable_mosaic.version = 11 : i64} {
  func.func @nc1_loss_kernel(%arg0: i32, %arg1: i32, %arg2: memref<8x128xf32, #tpu.memory_space<vmem>>, %arg3: memref<8x1xi32, #tpu.memory_space<vmem>>, %arg4: memref<128x128xbf16, #tpu.memory_space<vmem>>, %arg5: memref<128x128xbf16, #tpu.memory_space<vmem>>, %arg6: memref<1x1x128xf32, #tpu.memory_space<vmem>>, %arg7: memref<1x1x128xf32, #tpu.memory_space<vmem>>) attributes {dimension_semantics = [#tpu.dimension_semantics<parallel>, #tpu.dimension_semantics<arbitrary>], iteration_bounds = array<i64: 1, 1>, scalar_prefetch = 0 : i64, scratch_operands = 0 : i64, tpu.core_type = #tpu.core_type<tc>, window_params = [{transform_indices = @transform_0, window_bounds = array<i64: 8, 128>}, {transform_indices = @transform_1, window_bounds = array<i64: 8, 1>}, {pipeline_mode = #tpu.pipeline_mode<synchronous>, transform_indices = @transform_2, window_bounds = array<i64: 128, 128>}, {pipeline_mode = #tpu.pipeline_mode<synchronous>, transform_indices = @transform_3, window_bounds = array<i64: 128, 128>}, {transform_indices = @transform_4, window_bounds = array<i64: 1, 1, 128>}, {transform_indices = @transform_5, window_bounds = array<i64: 1, 1, 128>}]} {
    %c0_i32 = arith.constant 0 : i32
    %0 = arith.cmpi eq, %arg1, %c0_i32 : i32
    %1 = arith.extui %0 : i1 to i32
    %c0_i32_0 = arith.constant 0 : i32
    %2 = arith.cmpi ne, %1, %c0_i32_0 : i32
    scf.if %2 {
      %cst_26 = arith.constant 0.000000e+00 : f32
      %48 = vector.broadcast %cst_26 : f32 to vector<1x1x128xf32>
      %c0_27 = arith.constant 0 : index
      %c0_28 = arith.constant 0 : index
      %c0_29 = arith.constant 0 : index
      %49 = vector.load %arg6[%c0_27, %c0_28, %c0_29] : memref<1x1x128xf32, #tpu.memory_space<vmem>>, vector<1x1x128xf32>
      tpu.vector_store %arg6[%c0_27, %c0_28, %c0_29], %48 {strides = array<i32>} : memref<1x1x128xf32, #tpu.memory_space<vmem>>, vector<1x1x128xf32>,
      %cst_30 = arith.constant 0.000000e+00 : f32
      %50 = vector.broadcast %cst_30 : f32 to vector<1x1x128xf32>
      %c0_31 = arith.constant 0 : index
      %c0_32 = arith.constant 0 : index
      %c0_33 = arith.constant 0 : index
      %51 = vector.load %arg7[%c0_31, %c0_32, %c0_33] : memref<1x1x128xf32, #tpu.memory_space<vmem>>, vector<1x1x128xf32>
      tpu.vector_store %arg7[%c0_31, %c0_32, %c0_33], %50 {strides = array<i32>} : memref<1x1x128xf32, #tpu.memory_space<vmem>>, vector<1x1x128xf32>,
    } else {
    }
    %c0 = arith.constant 0 : index
    %c0_1 = arith.constant 0 : index
    %3 = vector.load %arg2[%c0, %c0_1] : memref<8x128xf32, #tpu.memory_space<vmem>>, vector<8x128xf32>
    %c0_2 = arith.constant 0 : index
    %c0_3 = arith.constant 0 : index
    %4 = vector.load %arg3[%c0_2, %c0_3] : memref<8x1xi32, #tpu.memory_space<vmem>>, vector<8x1xi32>
    %c1_i32 = arith.constant 1 : i32
    %5 = arith.muli %arg0, %c1_i32 : i32
    %6 = arith.addi %5, %arg1 : i32
    %c8_i32 = arith.constant 8 : i32
    %7 = arith.muli %6, %c8_i32 : i32
    %8 = tpu.iota {dimensions = array<i32: 0>} : vector<8x1xi32>
    %9 = vector.broadcast %7 : i32 to vector<8x1xi32>
    %10 = arith.addi %9, %8 : vector<8x1xi32>
    %c8_i32_4 = arith.constant 8 : i32
    %11 = vector.broadcast %c8_i32_4 : i32 to vector<8x1xi32>
    %12 = arith.cmpi slt, %10, %11 : vector<8x1xi32>
    %13 = tpu.iota {dimensions = array<i32: 1>} : vector<8x128xi32>
    %14 = vector.broadcast %4 : vector<8x1xi32> to vector<8x128xi32>
    %15 = arith.cmpi eq, %14, %13 : vector<8x128xi32>
    %16 = vector.broadcast %12 : vector<8x1xi1> to vector<8x128xi1>
    %17 = arith.andi %15, %16 : vector<8x128xi1>
    %18 = arith.extui %17 : vector<8x128xi1> to vector<8x128xi32>
    %19 = arith.sitofp %18 : vector<8x128xi32> to vector<8x128xf32>
    %20 = arith.truncf %19 : vector<8x128xf32> to vector<8x128xbf16>
    %c0_5 = arith.constant 0 : index
    %c0_6 = arith.constant 0 : index
    %21 = vector.load %arg4[%c0_5, %c0_6] : memref<128x128xbf16, #tpu.memory_space<vmem>>, vector<128x128xbf16>
    %cst = arith.constant dense<0.000000e+00> : vector<8x128xf32>
    %22 = tpu.matmul %20, %21, %cst {dimension_numbers = #tpu.dot_dimension_numbers<[1], [0], [0], [1], [0, 0, 1, 1], [], []>} : vector<8x128xbf16>, vector<128x128xbf16>, vector<8x128xf32> -> vector<8x128xf32>
    %c0_7 = arith.constant 0 : index
    %c0_8 = arith.constant 0 : index
    %23 = vector.load %arg5[%c0_7, %c0_8] : memref<128x128xbf16, #tpu.memory_space<vmem>>, vector<128x128xbf16>
    %cst_9 = arith.constant dense<0.000000e+00> : vector<8x128xf32>
    %24 = tpu.matmul %20, %23, %cst_9 {dimension_numbers = #tpu.dot_dimension_numbers<[1], [0], [0], [1], [0, 0, 1, 1], [], []>} : vector<8x128xbf16>, vector<128x128xbf16>, vector<8x128xf32> -> vector<8x128xf32>
    %25 = arith.addf %22, %24 : vector<8x128xf32>
    %26 = arith.subf %3, %25 : vector<8x128xf32>
    %27 = arith.mulf %26, %26 : vector<8x128xf32>
    %cst_10 = arith.constant dense<0.000000e+00> : vector<8xf32>
    %28 = vector.multi_reduction <add>, %27, %cst_10 [1] : vector<8x128xf32> to vector<8xf32>
    %29 = vector.shape_cast %28 : vector<8xf32> to vector<8x1xf32>
    %cst_11 = arith.constant 0.000000e+00 : f32
    %30 = vector.shape_cast %29 : vector<8x1xf32> to vector<8x1xf32>
    %31 = vector.broadcast %30 : vector<8x1xf32> to vector<8x128xf32>
    %32 = vector.broadcast %cst_11 : f32 to vector<8x128xf32>
    %33 = arith.select %17, %31, %32 : vector<8x128xi1>, vector<8x128xf32>
    %cst_12 = arith.constant dense<0.000000e+00> : vector<128xf32>
    %34 = vector.multi_reduction <add>, %33, %cst_12 [0] : vector<8x128xf32> to vector<128xf32>
    %35 = vector.shape_cast %34 : vector<128xf32> to vector<1x128xf32>
    %36 = arith.extui %17 : vector<8x128xi1> to vector<8x128xi32>
    %37 = arith.sitofp %36 : vector<8x128xi32> to vector<8x128xf32>
    %cst_13 = arith.constant dense<0.000000e+00> : vector<128xf32>
    %38 = vector.multi_reduction <add>, %37, %cst_13 [0] : vector<8x128xf32> to vector<128xf32>
    %39 = vector.shape_cast %38 : vector<128xf32> to vector<1x128xf32>
    %c0_14 = arith.constant 0 : index
    %c0_15 = arith.constant 0 : index
    %c0_16 = arith.constant 0 : index
    %40 = vector.load %arg6[%c0_14, %c0_15, %c0_16] : memref<1x1x128xf32, #tpu.memory_space<vmem>>, vector<1x1x128xf32>
    %41 = vector.shape_cast %35 : vector<1x128xf32> to vector<1x1x128xf32>
    %42 = arith.addf %40, %41 : vector<1x1x128xf32>
    %c0_17 = arith.constant 0 : index
    %c0_18 = arith.constant 0 : index
    %c0_19 = arith.constant 0 : index
    %43 = vector.load %arg6[%c0_17, %c0_18, %c0_19] : memref<1x1x128xf32, #tpu.memory_space<vmem>>, vector<1x1x128xf32>
    tpu.vector_store %arg6[%c0_17, %c0_18, %c0_19], %42 {strides = array<i32>} : memref<1x1x128xf32, #tpu.memory_space<vmem>>, vector<1x1x128xf32>,
    %c0_20 = arith.constant 0 : index
    %c0_21 = arith.constant 0 : index
    %c0_22 = arith.constant 0 : index
    %44 = vector.load %arg7[%c0_20, %c0_21, %c0_22] : memref<1x1x128xf32, #tpu.memory_space<vmem>>, vector<1x1x128xf32>
    %45 = vector.shape_cast %39 : vector<1x128xf32> to vector<1x1x128xf32>
    %46 = arith.addf %44, %45 : vector<1x1x128xf32>
    %c0_23 = arith.constant 0 : index
    %c0_24 = arith.constant 0 : index
    %c0_25 = arith.constant 0 : index
    %47 = vector.load %arg7[%c0_23, %c0_24, %c0_25] : memref<1x1x128xf32, #tpu.memory_space<vmem>>, vector<1x1x128xf32>
    tpu.vector_store %arg7[%c0_23, %c0_24, %c0_25], %46 {strides = array<i32>} : memref<1x1x128xf32, #tpu.memory_space<vmem>>, vector<1x1x128xf32>,
    return
  }
  func.func @transform_0(%arg0: i32, %arg1: i32) -> (i32, i32) {
    %c1_i32 = arith.constant 1 : i32
    %0 = arith.muli %arg0, %c1_i32 : i32
    %1 = arith.addi %0, %arg1 : i32
    %c0_i32 = arith.constant 0 : i32
    %2 = arith.minsi %1, %c0_i32 : i32
    %c0_i32_0 = arith.constant 0 : i32
    %c0_i32_1 = arith.constant 0 : i32
    return %2, %c0_i32_0 : i32, i32
  }
  func.func @transform_1(%arg0: i32, %arg1: i32) -> (i32, i32) {
    %c1_i32 = arith.constant 1 : i32
    %0 = arith.muli %arg0, %c1_i32 : i32
    %1 = arith.addi %0, %arg1 : i32
    %c0_i32 = arith.constant 0 : i32
    %2 = arith.minsi %1, %c0_i32 : i32
    %c0_i32_0 = arith.constant 0 : i32
    %c0_i32_1 = arith.constant 0 : i32
    return %2, %c0_i32_0 : i32, i32
  }
  func.func @transform_2(%arg0: i32, %arg1: i32) -> (i32, i32) {
    %c0_i32 = arith.constant 0 : i32
    %c0_i32_0 = arith.constant 0 : i32
    %c0_i32_1 = arith.constant 0 : i32
    return %c0_i32, %c0_i32_0 : i32, i32
  }
  func.func @transform_3(%arg0: i32, %arg1: i32) -> (i32, i32) {
    %c0_i32 = arith.constant 0 : i32
    %c0_i32_0 = arith.constant 0 : i32
    %c0_i32_1 = arith.constant 0 : i32
    return %c0_i32, %c0_i32_0 : i32, i32
  }
  func.func @transform_4(%arg0: i32, %arg1: i32) -> (i32, i32, i32) {
    %c0_i32 = arith.constant 0 : i32
    %c0_i32_0 = arith.constant 0 : i32
    %c0_i32_1 = arith.constant 0 : i32
    return %arg0, %c0_i32, %c0_i32_0 : i32, i32, i32
  }
  func.func @transform_5(%arg0: i32, %arg1: i32) -> (i32, i32, i32) {
    %c0_i32 = arith.constant 0 : i32
    %c0_i32_0 = arith.constant 0 : i32
    %c0_i32_1 = arith.constant 0 : i32
    return %arg0, %c0_i32, %c0_i32_0 : i32, i32, i32
  }
}

</mosaic_0001>

<bundles_post_ra>
// kernel: tpu_custom_call.1
= control target key start
LH: loop header
LB: loop body
LE: loop exit
PB: predicated region body
PF: predicated region fallthrough
CT: control target
= control target key end

     0   :  { %11 = vsyncpa [#allocation3], 0  ;;  %s660_s0 = inlined_call_operand.vmem [shape: f32[8,128], index: 0, kind: input, shape index: {}]   ;;  %s661_s1 = inlined_call_operand.vmem [shape: s32[8,1], index: 1, kind: input, shape index: {}]   ;;  %s662_s2 = inlined_call_operand.hbm [shape: bf16[128,128], index: 2, kind: input, shape index: {}]   ;;  %s663_s3 = inlined_call_operand.hbm [shape: bf16[128,128], index: 3, kind: input, shape index: {}]   ;;  %s664_s4 = inlined_call_operand.hbm [shape: f32[1,1,128], index: 4, kind: output, shape index: {0}]   ;;  %s665_s5 = inlined_call_operand.hbm [shape: f32[1,1,128], index: 5, kind: output, shape index: {1}]  }
   0x1   :  { %12 = vsyncpa [#allocation6], 0 }
   0x2   :  { %13 = vsyncpa [#allocation4], 0 }
   0x3   :  { %14 = vsyncpa [#allocation9], 0  ;;  %s598_s18 = smov [#allocation2]  }
   0x4   :  { %s44_s19 = sshll.u32 %s598_s18, 4  ;;  %s45_s19 = int_to_ptr.vmem [resolvable:$true] %s44_s19 }
   0x5   :  { %s518_s20 = scalar_lea.vmem %s45_s19, 1024  ;;  %p523_p1 = scmp.lt.s32.totalorder %s45_s19, %s45_s19 }
   0x6   :  { %p519_p0 = scmp.ne.s32.totalorder %s45_s19, %s518_s20  ;;  %p524_p2 = scmp.lt.s32.totalorder %s518_s20, %s518_s20 }
   0x8   :  { %p525_p3 = por %p524_p2, %p523_p1 }
   0xa   :  { %p526_p4 = pnand %p525_p3, %p519_p0 }
   0xc   :  { %529 = shalt.err (!%p526_p4)
}
   0xd   :  { %s599_s21 = smov 64   ;;  %s600_s22 = smov 4  }
   0xe   :  { %50 = dma.hbm_to_vmem [thread:$0]  %s662_s2, 1024, %s45_s19, [#allocation3], %s599_s21, %s599_s21, %s600_s22  }
   0xf   :  { %s601_s25 = smov [#allocation5]  }
  0x10   :  { %s56_s26 = sshll.u32 %s601_s25, 4  ;;  %s57_s26 = int_to_ptr.vmem [resolvable:$true] %s56_s26 }
  0x11   :  { %s538_s27 = scalar_lea.vmem %s57_s26, 1024  ;;  %p543_p6 = scmp.lt.s32.totalorder %s57_s26, %s57_s26 }
  0x12   :  { %p539_p5 = scmp.ne.s32.totalorder %s57_s26, %s538_s27  ;;  %p544_p7 = scmp.lt.s32.totalorder %s538_s27, %s538_s27 }
  0x14   :  { %p545_p8 = por %p544_p7, %p543_p6 }
  0x16   :  { %p546_p9 = pnand %p545_p8, %p539_p5 }
  0x18   :  { %549 = shalt.err (!%p546_p9)
}
  0x19   :  { %62 = dma.hbm_to_vmem [thread:$0]  %s663_s3, 1024, %s57_s26, [#allocation6], %s599_s21, %s599_s21, %s600_s22  }
  0x1a   :  { %590 = dma.done.wait [#allocation3], 1024  }
  0x1b   :  { %591 = vsyncadd [#allocation3], 4294966272 }
  0x1c   :  { %592 = dma.done.wait [#allocation6], 1024  }
  0x1d   :  { %593 = vsyncadd [#allocation6], 4294966272  ;;  %v602_v0 = vmov 0   ;;  %v603_v1 = vmov 0.0   ;;  %vm604_vm0 = vmmov 0   ;;  %v111_v2 = vld [vmem:[%s661_s1] sm:$0xff]  ;;  %v119_v19 = vlaneseq }
  0x1e   :  { %493 = vset.pattern.permute.xlu0 %v602_v0  ;;  %443 = vmatprep.subr.bf16.mxu0 %v603_v1  ;;  %108 = vst [vmem:[#allocation7] sm:$0x1] %v603_v1  ;;  %109 = vst [vmem:[#allocation8] sm:$0x1] %v603_v1  ;;  %v494_v3 = vld [vmem:[#allocation5 + $0x38] sm:$0xff]   ;;  %v496_v5 = vld [vmem:[#allocation5 + $0x30] sm:$0xff]  }
  0x1f   :  { %463 = vmatprep.subr.bf16.mxu1 %v603_v1  ;;  %459 = vmatprep.mubr.msk.bf16.mxu0 %vm604_vm0, %v603_v1  ;;  %v495_v4 = vld [vmem:[#allocation2 + $0x38] sm:$0xff]   ;;  %v497_v6 = vld [vmem:[#allocation2 + $0x30] sm:$0xff]   ;;  %v498_v7 = vld [vmem:[#allocation5 + $0x28] sm:$0xff]   ;;  %v120_v20 = vand.u32 127, %v119_v19  ;;  %v605_v24 = vmov 1.0|1.0  }
  0x20   :  { %479 = vmatprep.mubr.msk.bf16.mxu1 %vm604_vm0, %v603_v1  ;;  %122 = vperm.xlu0 %493, %v111_v2   ;;  %v499_v8 = vld [vmem:[#allocation2 + $0x28] sm:$0xff]   ;;  %v500_v9 = vld [vmem:[#allocation5 + $0x20] sm:$0xff]   ;;  %v502_v11 = vld [vmem:[#allocation5 + $0x18] sm:$0xff]   ;;  %s606_s6 = smov [#allocation8]  }
  0x21   :  { %444 = vmatpush3.bf16.msra.mxu0 %v494_v3  ;;  %464 = vmatpush3.bf16.msra.mxu1 %v495_v4  ;;  %v501_v10 = vld [vmem:[#allocation2 + $0x20] sm:$0xff]   ;;  %v503_v12 = vld [vmem:[#allocation2 + $0x18] sm:$0xff]   ;;  %v504_v13 = vld [vmem:[#allocation5 + $0x10] sm:$0xff]   ;;  %s378_s7 = sshll.u32 %s606_s6, 4  ;;  %s379_s7 = int_to_ptr.vmem [resolvable:$true] %s378_s7 }
  0x22   :  { %445 = vmatprep.subr.bf16.mxu0 %v603_v1  ;;  %465 = vmatprep.subr.bf16.mxu1 %v603_v1  ;;  %v505_v14 = vld [vmem:[#allocation2 + $0x10] sm:$0xff]   ;;  %v506_v15 = vld [vmem:[#allocation5 + $0x8] sm:$0xff]   ;;  %v508_v17 = vld [vmem:[#allocation5] sm:$0xff]   ;;  %s550_s8 = scalar_lea.vmem %s379_s7, 16  ;;  %s554_s9 = scalar_lea.vmem %s379_s7, 32 }
  0x23   :  { %v507_v16 = vld [vmem:[#allocation2 + $0x8] sm:$0xff]   ;;  %v509_v18 = vld [vmem:[#allocation2] sm:$0xff]   ;;  %p551_p10 = scmp.ne.s32.totalorder %s379_s7, %s550_s8  ;;  %p555_p11 = scmp.lt.s32.totalorder %s379_s7, %s379_s7 }
  0x24   :  { %v110_v34 = vld [vmem:[%s660_s0] sm:$0xff]  ;;  %p556_p12 = scmp.lt.s32.totalorder %s554_s9, %s550_s8 }
  0x25   :  { %446 = vmatpush3.bf16.msra.mxu0 %v496_v5  ;;  %466 = vmatpush3.bf16.msra.mxu1 %v497_v6  ;;  %v359_v29 = vld [vmem:[#allocation8] sm:$0x1] }
  0x26   :  { %447 = vmatprep.subr.bf16.mxu0 %v603_v1  ;;  %467 = vmatprep.subr.bf16.mxu1 %v603_v1  ;;  %p557_p13 = por %p556_p12, %p555_p11 }
  0x28   :  { %p558_p0 = pnand %p557_p13, %p551_p10 }
  0x29   :  { %448 = vmatpush3.bf16.msra.mxu0 %v498_v7  ;;  %468 = vmatpush3.bf16.msra.mxu1 %v499_v8 }
  0x2a   :  { %449 = vmatprep.subr.bf16.mxu0 %v603_v1  ;;  %469 = vmatprep.subr.bf16.mxu1 %v603_v1 }
  0x2d   :  { %450 = vmatpush3.bf16.msra.mxu0 %v500_v9  ;;  %470 = vmatpush3.bf16.msra.mxu1 %v501_v10 }
  0x2e   :  { %451 = vmatprep.subr.bf16.mxu0 %v603_v1  ;;  %471 = vmatprep.subr.bf16.mxu1 %v603_v1 }
  0x31   :  { %452 = vmatpush3.bf16.msra.mxu0 %v502_v11  ;;  %472 = vmatpush3.bf16.msra.mxu1 %v503_v12 }
  0x32   :  { %453 = vmatprep.subr.bf16.mxu0 %v603_v1  ;;  %473 = vmatprep.subr.bf16.mxu1 %v603_v1 }
  0x35   :  { %454 = vmatpush3.bf16.msra.mxu0 %v504_v13  ;;  %474 = vmatpush3.bf16.msra.mxu1 %v505_v14 }
  0x36   :  { %455 = vmatprep.subr.bf16.mxu0 %v603_v1  ;;  %475 = vmatprep.subr.bf16.mxu1 %v603_v1 }
  0x39   :  { %456 = vmatpush3.bf16.msra.mxu0 %v506_v15  ;;  %476 = vmatpush3.bf16.msra.mxu1 %v507_v16 }
  0x3a   :  { %457 = vmatprep.subr.bf16.mxu0 %v603_v1  ;;  %477 = vmatprep.subr.bf16.mxu1 %v603_v1 }
  0x3d   :  { %458 = vmatpush3.bf16.msra.mxu0 %v508_v17  ;;  %478 = vmatpush3.bf16.msra.mxu1 %v509_v18 }
  0x9b   :  { %v123_v21 = vpop.permute.xlu0 %122 }
  0x9c   :  { %vm124_vm1 = vcmp.eq.s32.totalorder %v123_v21, %v120_v20 }
  0x9d   :  { %v404_v22 = vsel %vm124_vm1, 1.0, %v603_v1  ;;  %vm413_vm2 = vmpackc.low %vm124_vm1, %vm124_vm1 }
  0x9e   :  { %v350_v23 = vrot.slane %v404_v22, 4  ;;  %460 = vmatmul.mubr.msk.bf16.vlgmr.msra.gmra.mxu0 %vm413_vm2, %v605_v24  ;;  %480 = vmatmul.mubr.msk.bf16.vlgmr.msra.gmra.mxu1 %vm413_vm2, %v605_v24 }
  0xa0   :  { %v351_v25 = vadd.f32 %v404_v22, %v350_v23 }
  0xa2   :  { %v352_v26 = vrot.slane %v351_v25, 2 }
  0xa4   :  { %v353_v27 = vadd.f32 %v352_v26, %v351_v25 }
  0xa6   :  { %v354_v28 = vrot.slane %v353_v27, 1 }
  0xa8   :  { %v355_v30 = vadd.f32 %v354_v28, %v353_v27 }
  0xaa   :  { %v360_v31 = vadd.f32 %v359_v29, %v355_v30 }
  0xac   :  { %361 = vst [vmem:[#allocation8] sm:$0x1] %v360_v31 }
 0x15e   :  { %v245_v32 = vpop.f32.mrf.mxu0  ;;  %v333_v33 = vpop.f32.mrf.mxu1 }
 0x15f   :  { %v334_v35 = vadd.f32 %v333_v33, %v245_v32 }
 0x160   :  { %v461_v36 = vpop.f32.mrf.mxu0  ;;  %v481_v37 = vpop.f32.mrf.mxu1 }
 0x161   :  { %v339_v38 = vsub.f32 %v110_v34, %v334_v35 }
 0x162   :  { %v248_v39 = vpop.f32.mrf.mxu0  ;;  %v336_v40 = vpop.f32.mrf.mxu1 }
 0x163   :  { %v340_v41 = vmul.f32 %v339_v38, %v339_v38 }
 0x164   :  { %v462_v42 = vpop.f32.mrf.mxu0  ;;  %v482_v43 = vpop.f32.mrf.mxu1 }
 0x165   :  { %341 = vadd.xlane.f32.xlu0 %v340_v41 }
 0x166   :  { %561 = shalt.err (!%p558_p0)
}
 0x167   :  { %381 = dma.vmem_to_hbm [thread:$0]  %s379_s7, 16, %s665_s5, [#allocation9]   ;;  %v356_v51 = vld [vmem:[#allocation7] sm:$0x1] }
 0x168   :  { %s607_s11 = smov [#allocation7]  }
 0x169   :  { %s368_s12 = sshll.u32 %s607_s11, 4  ;;  %s369_s12 = int_to_ptr.vmem [resolvable:$true] %s368_s12 }
 0x16a   :  { %s570_s13 = scalar_lea.vmem %s369_s12, 16  ;;  %s574_s14 = scalar_lea.vmem %s369_s12, 32 }
 0x16b   :  { %p571_p1 = scmp.ne.s32.totalorder %s369_s12, %s570_s13  ;;  %p575_p2 = scmp.lt.s32.totalorder %s369_s12, %s369_s12 }
 0x16c   :  { %p576_p3 = scmp.lt.s32.totalorder %s574_s14, %s570_s13 }
 0x16e   :  { %p577_p4 = por %p576_p3, %p575_p2 }
 0x170   :  { %p578_p5 = pnand %p577_p4, %p571_p1 }
 0x1ee   :  { %v342_v44 = vpop.xlane.xlu0 %341 }
 0x1ef   :  { %v343_v45 = vsel %vm124_vm1, %v342_v44, 0.0 }
 0x1f0   :  { %v344_v46 = vrot.slane %v343_v45, 4 }
 0x1f2   :  { %v345_v47 = vadd.f32 %v344_v46, %v343_v45 }
 0x1f4   :  { %v346_v48 = vrot.slane %v345_v47, 2 }
 0x1f6   :  { %v347_v49 = vadd.f32 %v346_v48, %v345_v47 }
 0x1f8   :  { %v348_v50 = vrot.slane %v347_v49, 1 }
 0x1fa   :  { %v349_v52 = vadd.f32 %v348_v50, %v347_v49 }
 0x1fc   :  { %v357_v53 = vadd.f32 %v356_v51, %v349_v52 }
 0x1fe   :  { %358 = vst [vmem:[#allocation7] sm:$0x1] %v357_v53 }
 0x1ff   :  { %581 = shalt.err (!%p578_p5)
}
 0x200   :  { %371 = dma.vmem_to_hbm [thread:$0]  %s369_s12, 16, %s664_s4, [#allocation4]  }
 0x201   :  { %594 = dma.done.wait [#allocation4], 16  }
 0x202   :  { %595 = vsyncadd [#allocation4], 4294967280 }
 0x203   :  { %596 = dma.done.wait [#allocation9], 16  }
 0x204   :  { %597 = vsyncadd [#allocation9], 4294967280 }
 0x205   :  { %388 = vsyncpa [#allocation3], 1 }
 0x206   :  { %389 = vsyncpa [#allocation6], 1 }
 0x207   :  { %390 = vsyncpa [#allocation4], 1 }
 0x208   :  { %391 = vsyncpa [#allocation9], 1 }

</bundles_post_ra>
